<compile_context>
chip_gen: v7x
topology: tpu7x:2x2x1
jax: 0.10.0
libtpu: 0.0.40
codegen_flags: <defaults>
</compile_context>

<pallas_src>
import functools

import jax
import jax.numpy as jnp
import numpy as np
from jax.experimental import pallas as pl
from jax.experimental.pallas import tpu as pltpu

_TARGET_TILE_BYTES = 2 * 1024 * 1024   # ~2 MiB of input per tile


def _round_up(x, m):
    return (x + m - 1) // m * m


def _sublane_multiple(dtype):
    # f32 -> 8, bf16 -> 16, int8/fp8 -> 32 sublane rows per vreg.
    itemsize = jnp.dtype(dtype).itemsize
    return max(8, 32 // itemsize)


# --------------------------------------------------------------------------
# Kernels
# --------------------------------------------------------------------------
def _ln_channels_last_kernel(x_ref, w_ref, b_ref, o_ref, *, eps):
    # x_ref: (TM, C)   w_ref/b_ref: (1, C)   o_ref: (TM, C)
    x = x_ref[...].astype(jnp.float32)
    mean = jnp.mean(x, axis=-1, keepdims=True)
    cent = x - mean
    var = jnp.mean(cent * cent, axis=-1, keepdims=True)      # biased variance
    y = cent * jax.lax.rsqrt(var + eps)                       # eps inside sqrt
    w = w_ref[...].astype(jnp.float32)
    b = b_ref[...].astype(jnp.float32)
    o_ref[...] = (y * w + b).astype(o_ref.dtype)


def _ln_channels_first_kernel(x_ref, w_ref, b_ref, o_ref, *, eps):
    # x_ref: (C, TL)   w_ref/b_ref: (C, 1)   o_ref: (C, TL)
    x = x_ref[...].astype(jnp.float32)
    mean = jnp.mean(x, axis=0, keepdims=True)                  # (1, TL)
    cent = x - mean
    var = jnp.mean(cent * cent, axis=0, keepdims=True)
    y = cent * jax.lax.rsqrt(var + eps)
    w = w_ref[...].astype(jnp.float32)
    b = b_ref[...].astype(jnp.float32)
    o_ref[...] = (y * w + b).astype(o_ref.dtype)


# --------------------------------------------------------------------------
# Wrappers
# --------------------------------------------------------------------------
def layer_norm_channels_last(x, weight, bias, *, eps=1e-6):
    """x: (..., C); normalize over the last axis. Matches F.layer_norm."""
    orig_shape = x.shape
    C = int(orig_shape[-1])
    M = int(np.prod(orig_shape[:-1]))
    x2 = x.reshape(M, C)                                   # free: collapse of major dims

    itemsize = jnp.dtype(x.dtype).itemsize
    align = _sublane_multiple(x.dtype)

    # ~2 MiB of input rows per tile, sublane-aligned.
    tm_bytes = max(align, (_TARGET_TILE_BYTES // max(1, C * itemsize)) // align * align)
    if M <= tm_bytes:
        TM = M                                             # single full-dim tile (always legal)
    else:
        TM = tm_bytes
    # Keep >= 2 grid tiles when possible so both v7x TensorCores get work.
    if M > align:
        TM = min(TM, _round_up(-(-M // 2), align))
    grid_m = pl.cdiv(M, TM)                                # last block may be partial; OOB writes dropped

    w2 = weight.reshape(1, C)
    b2 = bias.reshape(1, C)

    kernel = functools.partial(_ln_channels_last_kernel, eps=float(eps))
    out = pl.pallas_call(
        kernel,
        out_shape=jax.ShapeDtypeStruct((M, C), x.dtype),
        grid=(grid_m,),
        in_specs=[
            pl.BlockSpec((TM, C), lambda i: (i, 0)),
            pl.BlockSpec((1, C), lambda i: (0, 0)),
            pl.BlockSpec((1, C), lambda i: (0, 0)),
        ],
        out_specs=pl.BlockSpec((TM, C), lambda i: (i, 0)),
        compiler_params=pltpu.CompilerParams(
            dimension_semantics=("parallel",)),
    )(x2, w2, b2)

    return out.reshape(orig_shape)


def layer_norm_channels_first(x, weight, bias, *, eps=1e-6):
    """x: (N, C, H, W); normalize over axis 1 (the channel axis)."""
    orig_shape = x.shape
    N, C = int(orig_shape[0]), int(orig_shape[1])
    L = int(np.prod(orig_shape[2:]))
    x3 = x.reshape(N, C, L)                                # free: collapse of trailing dims

    itemsize = jnp.dtype(x.dtype).itemsize

    # ~2 MiB of input per (C, TL) tile, lane-aligned (multiple of 128).
    tl_bytes = max(128, (_TARGET_TILE_BYTES // max(1, C * itemsize)) // 128 * 128)
    if L <= tl_bytes:
        TL = L                                             # single full-dim tile along L (always legal)
    else:
        TL = tl_bytes
    # If the batch axis alone can't feed both v7x TensorCores, split L too.
    if N == 1 and L > 128:
        TL = min(TL, _round_up(-(-L // 2), 128))
    grid = (N, pl.cdiv(L, TL))                             # last L block may be partial

    w2 = weight.reshape(C, 1)
    b2 = bias.reshape(C, 1)

    kernel = functools.partial(_ln_channels_first_kernel, eps=float(eps))
    out = pl.pallas_call(
        kernel,
        out_shape=jax.ShapeDtypeStruct((N, C, L), x.dtype),
        grid=grid,
        in_specs=[
            pl.BlockSpec((pl.Squeezed(), C, TL), lambda n, j: (n, 0, j)),
            pl.BlockSpec((C, 1), lambda n, j: (0, 0)),
            pl.BlockSpec((C, 1), lambda n, j: (0, 0)),
        ],
        out_specs=pl.BlockSpec((pl.Squeezed(), C, TL), lambda n, j: (n, 0, j)),
        compiler_params=pltpu.CompilerParams(
            dimension_semantics=("parallel", "parallel")),
    )(x3, w2, b2)

    return out.reshape(orig_shape)


def layer_norm(x, weight, bias, *, eps=1e-6, data_format="channels_last"):
    if data_format == "channels_last":
        return layer_norm_channels_last(x, weight, bias, eps=eps)
    elif data_format == "channels_first":
        return layer_norm_channels_first(x, weight, bias, eps=eps)
    raise NotImplementedError(data_format)


# --------------------------------------------------------------------------
# Pure-JAX references mirroring the PyTorch module
# --------------------------------------------------------------------------
def _reference_channels_last(x, w, b, eps):
    mean = jnp.mean(x, axis=-1, keepdims=True)
    var = jnp.mean((x - mean) ** 2, axis=-1, keepdims=True)
    return (x - mean) * jax.lax.rsqrt(var + eps) * w + b


def _reference_channels_first(x, w, b, eps):
    u = jnp.mean(x, axis=1, keepdims=True)
    s = jnp.mean((x - u) ** 2, axis=1, keepdims=True)
    xn = (x - u) / jnp.sqrt(s + eps)
    return w[:, None, None] * xn + b[:, None, None]


if __name__ == "__main__":
    key = jax.random.PRNGKey(0)
    k1, k2, k3, k4, k5 = jax.random.split(key, 5)
    eps = 1e-6

    # ConvNeXt-ish small shapes; spatial chosen NOT tile-divisible to exercise
    # the partial-block (no-pad) path, and C=96 (a real ConvNeXt stage width).
    N, H, W, C = 2, 7, 7, 96
    weight = 1.0 + 0.1 * jax.random.normal(k2, (C,), jnp.float32)
    bias = 0.1 * jax.random.normal(k3, (C,), jnp.float32)

    # ---- channels_last: (N, H, W, C) ----
    x_cl = jax.random.normal(k1, (N, H, W, C), jnp.float32)
    out_cl = jax.block_until_ready(
        layer_norm(x_cl, weight, bias, eps=eps, data_format="channels_last"))
    ref_cl = _reference_channels_last(x_cl, weight, bias, eps)
    np.testing.assert_allclose(np.asarray(out_cl), np.asarray(ref_cl),
                               rtol=1e-5, atol=1e-5)

    # ---- channels_first: (N, C, H, W) ----
    x_cf = jax.random.normal(k4, (N, C, H, W), jnp.float32)
    out_cf = jax.block_until_ready(
        layer_norm(x_cf, weight, bias, eps=eps, data_format="channels_first"))
    ref_cf = _reference_channels_first(x_cf, weight, bias, eps)
    np.testing.assert_allclose(np.asarray(out_cf), np.asarray(ref_cf),
                               rtol=1e-5, atol=1e-5)

    # ---- bf16 channels_last: exercises dtype-aware sublane alignment ----
    x_bf = jax.random.normal(k5, (2, 4, 4, C), jnp.float32).astype(jnp.bfloat16)
    out_bf = jax.block_until_ready(
        layer_norm(x_bf, weight, bias, eps=eps, data_format="channels_last"))
    ref_bf = _reference_channels_last(x_bf.astype(jnp.float32), weight, bias, eps)
    np.testing.assert_allclose(np.asarray(out_bf, dtype=np.float32),
                               np.asarray(ref_bf), rtol=5e-2, atol=5e-2)

    print("KERNEL_OK")
</pallas_src>

<mosaic_0001>
module attributes {stable_mosaic.version = 11 : i64} {
  func.func @_ln_channels_last_kernel(%arg0: i32, %arg1: memref<56x96xf32, #tpu.memory_space<vmem>>, %arg2: memref<1x96xf32, #tpu.memory_space<vmem>>, %arg3: memref<1x96xf32, #tpu.memory_space<vmem>>, %arg4: memref<56x96xf32, #tpu.memory_space<vmem>>) attributes {dimension_semantics = [#tpu.dimension_semantics<parallel>], iteration_bounds = array<i64: 2>, scalar_prefetch = 0 : i64, scratch_operands = 0 : i64, tpu.core_type = #tpu.core_type<tc>, window_params = [{transform_indices = @transform_0, window_bounds = array<i64: 56, 96>}, {pipeline_mode = #tpu.pipeline_mode<synchronous>, transform_indices = @transform_1, window_bounds = array<i64: 1, 96>}, {pipeline_mode = #tpu.pipeline_mode<synchronous>, transform_indices = @transform_2, window_bounds = array<i64: 1, 96>}, {transform_indices = @transform_3, window_bounds = array<i64: 56, 96>}]} {
    %c0 = arith.constant 0 : index
    %c0_0 = arith.constant 0 : index
    %0 = vector.load %arg1[%c0, %c0_0] : memref<56x96xf32, #tpu.memory_space<vmem>>, vector<56x96xf32>
    %cst = arith.constant dense<0.000000e+00> : vector<56xf32>
    %1 = vector.multi_reduction <add>, %0, %cst [1] : vector<56x96xf32> to vector<56xf32>
    %2 = vector.shape_cast %1 : vector<56xf32> to vector<56x1xf32>
    %cst_1 = arith.constant 9.600000e+01 : f32
    %3 = vector.broadcast %cst_1 : f32 to vector<56x1xf32>
    %4 = arith.divf %2, %3 : vector<56x1xf32>
    %5 = vector.broadcast %4 : vector<56x1xf32> to vector<56x96xf32>
    %6 = arith.subf %0, %5 : vector<56x96xf32>
    %7 = arith.mulf %6, %6 : vector<56x96xf32>
    %cst_2 = arith.constant dense<0.000000e+00> : vector<56xf32>
    %8 = vector.multi_reduction <add>, %7, %cst_2 [1] : vector<56x96xf32> to vector<56xf32>
    %9 = vector.shape_cast %8 : vector<56xf32> to vector<56x1xf32>
    %cst_3 = arith.constant 9.600000e+01 : f32
    %10 = vector.broadcast %cst_3 : f32 to vector<56x1xf32>
    %11 = arith.divf %9, %10 : vector<56x1xf32>
    %cst_4 = arith.constant 9.99999997E-7 : f32
    %12 = vector.broadcast %cst_4 : f32 to vector<56x1xf32>
    %13 = arith.addf %11, %12 : vector<56x1xf32>
    %14 = math.rsqrt %13 : vector<56x1xf32>
    %15 = vector.broadcast %14 : vector<56x1xf32> to vector<56x96xf32>
    %16 = arith.mulf %6, %15 : vector<56x96xf32>
    %c0_5 = arith.constant 0 : index
    %c0_6 = arith.constant 0 : index
    %17 = vector.load %arg2[%c0_5, %c0_6] : memref<1x96xf32, #tpu.memory_space<vmem>>, vector<1x96xf32>
    %c0_7 = arith.constant 0 : index
    %c0_8 = arith.constant 0 : index
    %18 = vector.load %arg3[%c0_7, %c0_8] : memref<1x96xf32, #tpu.memory_space<vmem>>, vector<1x96xf32>
    %19 = vector.broadcast %17 : vector<1x96xf32> to vector<56x96xf32>
    %20 = arith.mulf %16, %19 : vector<56x96xf32>
    %21 = vector.broadcast %18 : vector<1x96xf32> to vector<56x96xf32>
    %22 = arith.addf %20, %21 : vector<56x96xf32>
    %c0_9 = arith.constant 0 : index
    %c0_10 = arith.constant 0 : index
    %23 = vector.load %arg4[%c0_9, %c0_10] : memref<56x96xf32, #tpu.memory_space<vmem>>, vector<56x96xf32>
    tpu.vector_store %arg4[%c0_9, %c0_10], %22 {strides = array<i32>} : memref<56x96xf32, #tpu.memory_space<vmem>>, vector<56x96xf32>,
    return
  }
  func.func @transform_0(%arg0: i32) -> (i32, i32) {
    %c0_i32 = arith.constant 0 : i32
    %c0_i32_0 = arith.constant 0 : i32
    return %arg0, %c0_i32 : i32, i32
  }
  func.func @transform_1(%arg0: i32) -> (i32, i32) {
    %c0_i32 = arith.constant 0 : i32
    %c0_i32_0 = arith.constant 0 : i32
    %c0_i32_1 = arith.constant 0 : i32
    return %c0_i32, %c0_i32_0 : i32, i32
  }
  func.func @transform_2(%arg0: i32) -> (i32, i32) {
    %c0_i32 = arith.constant 0 : i32
    %c0_i32_0 = arith.constant 0 : i32
    %c0_i32_1 = arith.constant 0 : i32
    return %c0_i32, %c0_i32_0 : i32, i32
  }
  func.func @transform_3(%arg0: i32) -> (i32, i32) {
    %c0_i32 = arith.constant 0 : i32
    %c0_i32_0 = arith.constant 0 : i32
    return %arg0, %c0_i32 : i32, i32
  }
}

</mosaic_0001>

<bundles_post_ra>
// kernel: tpu_custom_call.1
= control target key start
LH: loop header
LB: loop body
LE: loop exit
PB: predicated region body
PF: predicated region fallthrough
CT: control target
= control target key end

     0   :  { %s804_s12 = smov 0   ;;  %s806_s13 = smov 0   ;;  %s969_s0 = inlined_call_operand.vmem [shape: f32[98,96], index: 0, kind: input, shape index: {}]   ;;  %s970_s1 = inlined_call_operand.vmem [shape: f32[1,96], index: 1, kind: input, shape index: {}]   ;;  %s971_s2 = inlined_call_operand.vmem [shape: f32[1,96], index: 2, kind: input, shape index: {}]   ;;  %s972_s3 = inlined_call_operand.vmem [shape: f32[98,96], index: 3, kind: output, shape index: {}]  }
   0x1   :  { %s808_s14 = smov 0  }
   0x2 LB: > { %s817_s15 = sadd.s32 4294967295, %s750_s14   ;;  %s819_s16 = sadd.s32 1, %s750_s14   ;;  %s750_s14 = sphi %s808_s14, %s979_s14   ;;  %s746_s13 = sphi %s806_s13, %s978_s13   ;;  %s742_s12 = sphi %s804_s12, %s977_s12  }
   0x3   : > { %s85_s17 = ssub.s32 %s750_s14, %s819_s16  ;;  %s88_s18 = sadd.s32 1, %s746_s13 }
   0x4   : > { %p86_p0 = scmp.eq.s32.totalorder %s85_s17, 0  ;;  %p98_p1 = scmp.ne.s32.totalorder %s746_s13, %s742_s12 }
   0x5   : > { %p99_p2 = scmp.eq.s32.totalorder %s817_s15, 1  ;;  %p571_p3 = scmp.ge.s32.totalorder %s750_s14, 1 }
   0x6   : > { %s827_s19 = scalar_select %p86_p0, %s746_s13, %s88_s18  }
   0x7   : > { %p829_p4 = por %p99_p2, %p98_p1  ;;  %p146_p5 = scmp.lt.s32.totalorder %s750_s14, 3 }
   0x9   : > { %p147_p6 = pnand %p571_p3, %p146_p5 }
   0xa   : > { %s834_s21 = smul.u32 (!%p147_p6), 7, %s817_s15  ;;  %vm199_vm0 = vcmask (!%p147_p6), 785408   ;;  %s170_s27 = sand.u32 (!%p147_p6), 1, %s742_s12  }
   0xb   : > { %150 = sbr.rel (%p147_p6) target bundleno = 411 (0x19b), region = 32 }
   0xc   : > { %p178_p7 = scmp.lt.s32.totalorder (!%p147_p6), %s834_s21, 12  ;;  %s588_s30 = smul.u32 (!%p147_p6), 56, %s170_s27 }
   0xe   : > { %s893_s6 = scalar_lea.vmem (!%p147_p6), [#allocation2], %s588_s30  }
  0x12   : > { %s179_s22 = scalar_select %p178_p7, %s834_s21, 12 }
  0x13   : > { %s335_s7 = ssub.s32 (%p829_p4), 13, %s834_s21  ;;  %s587_s8 = smul.u32 (%p829_p4), 56, %s817_s15 }
  0x14   : > { %s572_s23 = sshll.u32 %s179_s22, 3  ;;  %p336_p8 = scmp.lt.s32.totalorder (%p829_p4), %s335_s7, 7 }
  0x15   : > { %s181_s26 = scalar_lea.vmem %s969_s0, %s572_s23  ;;  %s920_s11 = scalar_lea.vmem (%p829_p4), %s972_s3, %s587_s8  }
  0x16   : > { %v192_v0 = vld [vmem:[%s181_s26] sm:$0xff]  ;;  %v194_v1 = vld [vmem:[%s181_s26 + $0x10] sm:$0xff]  ;;  %v193_v2 = vld [vmem:[%s181_s26 + $0x8] sm:$0xff] }
  0x17   : > { %v200_v3 = vsel %vm199_vm0, %v192_v0, 0.0  ;;  %v206_v4 = vsel %vm199_vm0, %v194_v1, 0.0  ;;  %v195_v5 = vld [vmem:[%s181_s26 + $0x18] sm:$0xff]  ;;  %v203_v6 = vsel %vm199_vm0, %v193_v2, 0.0  ;;  %v196_v8 = vld [vmem:[%s181_s26 + $0x20] sm:$0xff]  ;;  %v197_v9 = vld [vmem:[%s181_s26 + $0x28] sm:$0xff] }
  0x18   : > { %201 = vadd.xlane.f32.xlu0 %v200_v3  ;;  %207 = vadd.xlane.f32.xlu1 %v206_v4  ;;  %v209_v7 = vsel %vm199_vm0, %v195_v5, 0.0  ;;  %v212_v10 = vsel %vm199_vm0, %v196_v8, 0.0  ;;  %v215_v11 = vsel %vm199_vm0, %v197_v9, 0.0  ;;  %v198_v12 = vld [vmem:[%s181_s26 + $0x30] sm:$0xff]  ;;  %v573_v4 = vld [vmem:[%s970_s1] ss:$0 sm:$0xff] }
  0x19   : > { %v218_v13 = vsel %vm199_vm0, %v198_v12, 0.0 }
  0x1c   : > { %204 = vadd.xlane.f32.xlu0 %v203_v6  ;;  %210 = vadd.xlane.f32.xlu1 %v209_v7 }
  0x20   : > { %213 = vadd.xlane.f32.xlu0 %v212_v10  ;;  %216 = vadd.xlane.f32.xlu1 %v215_v11 }
  0x24   : > { %219 = vadd.xlane.f32.xlu0 %v218_v13 }
  0xa5   : > { %v202_v14 = vpop.xlane.xlu0 %201  ;;  %v208_v15 = vpop.xlane.xlu1 %207 }
  0xa6   : > { %v222_v16 = vmul.f32 0.010416667, %v202_v14  ;;  %v224_v17 = vmul.f32 0.010416667, %v208_v15 }
  0xa8   : > { %v848_v18 = vsub.f32 %v192_v0, %v222_v16  ;;  %v850_v19 = vsub.f32 %v194_v1, %v224_v17 }
  0xa9   : > { %v205_v20 = vpop.xlane.xlu0 %204  ;;  %v211_v21 = vpop.xlane.xlu1 %210 }
  0xaa   : > { %v223_v22 = vmul.f32 0.010416667, %v205_v20  ;;  %v225_v23 = vmul.f32 0.010416667, %v211_v21  ;;  %v236_v24 = vmul.f32 %v848_v18, %v848_v18  ;;  %v238_v25 = vmul.f32 %v850_v19, %v850_v19 }
  0xac   : > { %v856_v26 = vsub.f32 %v193_v2, %v223_v22  ;;  %v858_v27 = vsub.f32 %v195_v5, %v225_v23  ;;  %v243_v28 = vsel %vm199_vm0, %v236_v24, 0.0  ;;  %v249_v31 = vsel %vm199_vm0, %v238_v25, 0.0 }
  0xad   : > { %244 = vadd.xlane.f32.xlu1 %v243_v28  ;;  %v214_v29 = vpop.xlane.xlu0 %213  ;;  %v217_v30 = vpop.xlane.xlu1 %216 }
  0xae   : > { %v226_v32 = vmul.f32 0.010416667, %v214_v29  ;;  %v227_v33 = vmul.f32 0.010416667, %v217_v30  ;;  %v237_v34 = vmul.f32 %v856_v26, %v856_v26  ;;  %v239_v35 = vmul.f32 %v858_v27, %v858_v27 }
  0xb0   : > { %v866_v36 = vsub.f32 %v196_v8, %v226_v32  ;;  %v868_v37 = vsub.f32 %v197_v9, %v227_v33  ;;  %v246_v38 = vsel %vm199_vm0, %v237_v34, 0.0  ;;  %v252_v41 = vsel %vm199_vm0, %v239_v35, 0.0  ;;  %v574_v9 = vld [vmem:[%s971_s2] ss:$0 sm:$0xff] }
  0xb1   : > { %250 = vadd.xlane.f32.xlu1 %v249_v31  ;;  %247 = vadd.xlane.f32.xlu0 %v246_v38  ;;  %v220_v39 = vpop.xlane.xlu0 %219 }
  0xb2   : > { %v228_v40 = vmul.f32 0.010416667, %v220_v39  ;;  %v240_v42 = vmul.f32 %v866_v36, %v866_v36  ;;  %v241_v43 = vmul.f32 %v868_v37, %v868_v37 }
  0xb4   : > { %v876_v44 = vsub.f32 %v198_v12, %v228_v40  ;;  %v255_v45 = vsel %vm199_vm0, %v240_v42, 0.0  ;;  %v258_v46 = vsel %vm199_vm0, %v241_v43, 0.0 }
  0xb5   : > { %253 = vadd.xlane.f32.xlu0 %v252_v41  ;;  %256 = vadd.xlane.f32.xlu1 %v255_v45 }
  0xb6   : > { %v242_v47 = vmul.f32 %v876_v44, %v876_v44 }
  0xb8   : > { %v261_v48 = vsel %vm199_vm0, %v242_v47, 0.0 }
  0xb9   : > { %259 = vadd.xlane.f32.xlu0 %v258_v46  ;;  %262 = vadd.xlane.f32.xlu1 %v261_v48 }
 0x13a   : > { %v245_v49 = vpop.xlane.xlu1 %244 }
 0x13b   : > { %v264_v50 = vmul.f32 0.010416667, %v245_v49 }
 0x13d   : > { %v271_v51 = vadd.f32 1e-06, %v264_v50 }
 0x13e   : > { %v251_v52 = vpop.xlane.xlu1 %250  ;;  %v248_v53 = vpop.xlane.xlu0 %247 }
 0x13f   : > { %678 = vrsqrt.f32 %v271_v51  ;;  %v266_v54 = vmul.f32 0.010416667, %v251_v52  ;;  %v265_v55 = vmul.f32 0.010416667, %v248_v53 }
 0x141   : > { %v273_v56 = vadd.f32 1e-06, %v266_v54  ;;  %v272_v57 = vadd.f32 1e-06, %v265_v55 }
 0x142   : > { %v257_v58 = vpop.xlane.xlu1 %256  ;;  %v254_v59 = vpop.xlane.xlu0 %253 }
 0x143   : > { %680 = vrsqrt.f32 %v273_v56  ;;  %v268_v60 = vmul.f32 0.010416667, %v257_v58  ;;  %v267_v61 = vmul.f32 0.010416667, %v254_v59 }
 0x144   : > { %682 = vrsqrt.f32 %v272_v57 }
 0x145   : > { %v275_v62 = vadd.f32 1e-06, %v268_v60  ;;  %v274_v63 = vadd.f32 1e-06, %v267_v61 }
 0x146   : > { %v263_v0 = vpop.xlane.xlu1 %262  ;;  %v260_v1 = vpop.xlane.xlu0 %259 }
 0x147   : > { %684 = vrsqrt.f32 %v275_v62  ;;  %v270_v2 = vmul.f32 0.010416667, %v263_v0  ;;  %v269_v3 = vmul.f32 0.010416667, %v260_v1 }
 0x148   : > { %686 = vrsqrt.f32 %v274_v63 }
 0x149   : > { %v679_v5 = vpop.eup %678  ;;  %v277_v6 = vadd.f32 1e-06, %v270_v2  ;;  %v276_v7 = vadd.f32 1e-06, %v269_v3 }
 0x14a   : > { %v285_v8 = vmul.f32 %v679_v5, %v848_v18 }
 0x14b   : > { %688 = vrsqrt.f32 %v277_v6 }
 0x14c   : > { %v300_v10 = vmul.f32 %v573_v4, %v285_v8  ;;  %690 = vrsqrt.f32 %v276_v7 }
 0x14d   : > { %v681_v11 = vpop.eup %680 }
 0x14e   : > { %v683_v12 = vpop.eup %682  ;;  %v313_v13 = vadd.f32 %v574_v9, %v300_v10  ;;  %v287_v14 = vmul.f32 %v681_v11, %v850_v19 }
 0x14f   : > { %v286_v15 = vmul.f32 %v683_v12, %v856_v26 }
 0x150   : > { %320 = vst.msk [vmem:[%s893_s6] sm:$0xff] %vm199_vm0, %v313_v13  ;;  %v302_v16 = vmul.f32 %v573_v4, %v287_v14 }
 0x151   : > { %v685_v17 = vpop.eup %684  ;;  %v301_v18 = vmul.f32 %v573_v4, %v286_v15 }
 0x152   : > { %v687_v20 = vpop.eup %686  ;;  %v315_v21 = vadd.f32 %v574_v9, %v302_v16  ;;  %v289_v22 = vmul.f32 %v685_v17, %v866_v36 }
 0x153   : > { %v314_v23 = vadd.f32 %v574_v9, %v301_v18  ;;  %v288_v19 = vmul.f32 %v687_v20, %v858_v27 }
 0x154   : > { %322 = vst.msk [vmem:[%s893_s6 + $0x10] sm:$0xff] %vm199_vm0, %v315_v21  ;;  %v304_v24 = vmul.f32 %v573_v4, %v289_v22 }
 0x155   : > { %v689_v25 = vpop.eup %688  ;;  %321 = vst.msk [vmem:[%s893_s6 + $0x8] sm:$0xff] %vm199_vm0, %v314_v23  ;;  %v303_v26 = vmul.f32 %v573_v4, %v288_v19 }
 0x156   : > { %v691_v28 = vpop.eup %690  ;;  %v317_v29 = vadd.f32 %v574_v9, %v304_v24  ;;  %v291_v30 = vmul.f32 %v689_v25, %v876_v44 }
 0x157   : > { %v316_v31 = vadd.f32 %v574_v9, %v303_v26  ;;  %v290_v32 = vmul.f32 %v691_v28, %v868_v37  ;;  %333 = sbr.rel (!%p829_p4) target bundleno = 411 (0x19b), region = 36 }
 0x158   : > { %324 = vst.msk [vmem:[%s893_s6 + $0x20] sm:$0xff] %vm199_vm0, %v317_v29  ;;  %v306_v33 = vmul.f32 %v573_v4, %v291_v30 }
 0x159   : > { %323 = vst.msk [vmem:[%s893_s6 + $0x18] sm:$0xff] %vm199_vm0, %v316_v31  ;;  %v305_v27 = vmul.f32 %v573_v4, %v290_v32 }
 0x15a   : > { %v319_v34 = vadd.f32 %v574_v9, %v306_v33 }
 0x15b   : > { %v318_v35 = vadd.f32 %v574_v9, %v305_v27 }
 0x15c   : > { %326 = vst.msk [vmem:[%s893_s6 + $0x30] sm:$0xff] %vm199_vm0, %v319_v34 }
 0x15d   : > { %325 = vst.msk [vmem:[%s893_s6 + $0x28] sm:$0xff] %vm199_vm0, %v318_v35 }
 0x15e   : > { %s981_s7 = smov (!%p336_p8, %s335_s7), 7 }
 0x15f   : > { %s575_s12 = sshll.u32 %s981_s7, 7 }
 0x160   : > { %p578_p9 = scmp.eq.s32.totalorder %s575_s12, 0 }
 0x161   : > { %692 = sdivrem.u32 (!%p578_p9), %s981_s7, 7 }
 0x162   : > { %344 = sbr.rel (%p578_p9) target bundleno = 411 (0x19b), region = 40 }
 0x16a   : > { %s926_s14 = spop.drf %692 }
 0x16b   : > { %p579_p10 = scmp.le.s32.totalorder %s926_s14, 0 }
 0x16c   : > { %s974_s15 = smov (!%p579_p10), %s920_s11  ;;  %s975_s17 = smov (!%p579_p10), %s893_s6 }
 0x16d   : > { %524 = sbr.rel (%p579_p10) target bundleno = 382 (0x17e), region = 116  ;;  %s935_s18 = smov (!%p579_p10), 0  }
 0x16e   : > { %s937_s20 = smov (!%p579_p10), 0  }
 0x174 LB: >> { %v420_v36 = vld [vmem:[%s758_s17] sm:$0xff]  ;;  %v422_v37 = vld [vmem:[%s758_s17 + $0x8] sm:$0xff]  ;;  %v424_v38 = vld [vmem:[%s758_s17 + $0x10] sm:$0xff]  ;;  %s434_s21 = sadd.s32 1, %s762_s18  ;;  %s414_s20 = sadd.s32 1, %s766_s20   ;;  %s766_s20 = sphi %s937_s20, %s414_s20   ;;  %s762_s18 = sphi %s935_s18, %s976_s18   ;;  %s758_s17 = sphi %s975_s17, %s439_s17   ;;  %s754_s15 = sphi %s974_s15, %s440_s15  }
 0x175   : >> { %421 = vst [vmem:[%s754_s15] sm:$0xff] %v420_v36  ;;  %423 = vst [vmem:[%s754_s15 + $0x8] sm:$0xff] %v422_v37  ;;  %v426_v39 = vld [vmem:[%s758_s17 + $0x18] sm:$0xff]  ;;  %v428_v40 = vld [vmem:[%s758_s17 + $0x20] sm:$0xff]  ;;  %p435_p11 = scmp.ge.s32.totalorder %s434_s21, %s926_s14  ;;  %p413_p12 = scmp.ge.s32.totalorder %s414_s20, %s926_s14 }
 0x176   : >> { %425 = vst [vmem:[%s754_s15 + $0x10] sm:$0xff] %v424_v38  ;;  %v430_v41 = vld [vmem:[%s758_s17 + $0x28] sm:$0xff]  ;;  %427 = vst [vmem:[%s754_s15 + $0x18] sm:$0xff] %v426_v39  ;;  %v432_v42 = vld [vmem:[%s758_s17 + $0x30] sm:$0xff] }
 0x177   : >> { %429 = vst [vmem:[%s754_s15 + $0x20] sm:$0xff] %v428_v40  ;;  %431 = vst [vmem:[%s754_s15 + $0x28] sm:$0xff] %v430_v41  ;;  %s983_s21 = smov (%p435_p11, %s434_s21), 0  ;;  %416 = sbr.rel (!%p413_p12) target bundleno = 372 (0x174), region = 122 }
 0x178   : >> { %433 = vst [vmem:[%s754_s15 + $0x30] sm:$0xff] %v432_v42  ;;  %s437_s22 = smul.u32 56, %s983_s21  ;;  %s976_s18 = smov %s983_s21 }
 0x17a   : >> { %s439_s17 = scalar_lea.vmem %s893_s6, %s437_s22 [#allocation2]   ;;  %s440_s15 = scalar_lea.vmem %s920_s11, %s437_s22  }
 0x17e PF: > { %694 = sdivrem.u32 %s981_s7, 7 }
 0x17f   : > { %s580_s23 = smul.u32 56, %s926_s14 }
 0x181   : > { %s445_s24 = scalar_lea.vmem %s893_s6, %s580_s23 [#allocation2]   ;;  %s447_s25 = scalar_lea.vmem %s920_s11, %s580_s23  }
 0x187   : > { %s695_s26 = spop.drf %694 }
 0x188   : > { %p582_p13 = scmp.le.s32.totalorder %s695_s26, 0 }
 0x189   : > { %s768_s27 = smov (!%p582_p13), %s447_s25   ;;  %s772_s28 = smov (!%p582_p13), %s445_s24  }
 0x18a   : > { %538 = sbr.rel (%p582_p13) target bundleno = 411 (0x19b), region = 127  ;;  %s776_s29 = smov (!%p582_p13), 0  }
 0x18b   : > { %s780_s30 = smov (!%p582_p13), 0  }
 0x191 LB: >> { %v457_v43 = vld [vmem:[%s774_s28] sm:$0xff]  ;;  %s459_s4 = sadd.s32 1, %s778_s29  ;;  %s451_s30 = sadd.s32 1, %s782_s30   ;;  %s782_s30 = sphi %s780_s30, %s451_s30   ;;  %s778_s29 = sphi %s776_s29, %s777_s29   ;;  %s774_s28 = sphi %s772_s28, %s464_s28   ;;  %s770_s27 = sphi %s768_s27, %s465_s27  }
 0x192   : >> { %458 = vst [vmem:[%s770_s27] sm:$0xff] %v457_v43  ;;  %p460_p0 = scmp.ge.s32.totalorder %s459_s4, %s695_s26  ;;  %p450_p1 = scmp.ge.s32.totalorder %s451_s30, %s695_s26 }
 0x194   : >> { %s985_s4 = smov (%p460_p0, %s459_s4), 0  ;;  %453 = sbr.rel (!%p450_p1) target bundleno = 401 (0x191), region = 133 }
 0x195   : >> { %s583_s5 = sshll.u32 %s985_s4, 3  ;;  %s777_s29 = smov %s985_s4  }
 0x196   : >> { %s464_s28 = scalar_lea.vmem %s445_s24, %s583_s5 [#allocation2]   ;;  %s465_s27 = scalar_lea.vmem %s447_s25, %s583_s5  }
 0x19b PF: > { %p10_p2 = scmp.ge.s32.totalorder %s819_s16, 4   ;;  %s977_s12 = smov %s746_s13 }
 0x19c   : > { %s978_s13 = smov %s827_s19  ;;  %s979_s14 = smov %s819_s16 }
 0x19d   :  { %12 = sbr.rel (!%p10_p2) target bundleno = 2 (0x2), region = 144 }

</bundles_post_ra>
